<compile_context>
chip_gen: v5e
topology: v5e:2x2
jax: 0.10.0
libtpu: 0.0.40
codegen_flags: <defaults>
</compile_context>

<pallas_src>
import jax
import jax.numpy as jnp
from jax.experimental import pallas as pl
from jax.experimental.pallas import tpu as pltpu


def _mlp_base_fused_kernel(x_ref, w1_ref, w2_ref, aux_ref, out_ref):
    # x_ref:   [TB, D]
    # w1_ref:  [D, 2H]   (actor_w1.T || critic_w1.T)
    # w2_ref:  [2H, 2H]  (block-diag: actor_w2.T top-left, critic_w2.T bottom-right)
    # aux_ref: [4, 2H]   rows: b1_fused, b2_fused, value-head row (zeros||wcl), bcl bcast
    # out_ref: [TB, 2H]  lanes [0,H) = actor hidden, lanes [H,2H) = value (broadcast)
    H = out_ref.shape[1] // 2

    x = x_ref[...].astype(jnp.float32)
    b1 = aux_ref[0:1, :]
    b2 = aux_ref[1:2, :]
    wv = aux_ref[2:3, :]          # zeros in actor lanes, critic_linear weights in critic lanes
    bv = aux_ref[3:4, 0:1]        # scalar critic_linear bias

    # Fused layer 1: one [TB,D] @ [D,2H] matmul + one tanh over a lane-dense tile.
    h1 = jnp.tanh(
        jnp.dot(x, w1_ref[...], preferred_element_type=jnp.float32) + b1
    )
    # Fused layer 2: block-diagonal weight keeps actor/critic branches independent.
    h2 = jnp.tanh(
        jnp.dot(h1, w2_ref[...], preferred_element_type=jnp.float32) + b2
    )

    # Value head on VPU + lane-reduce (no N=1 MXU pass): critic lanes only via wv mask.
    value = jnp.sum(h2 * wv, axis=-1, keepdims=True) + bv          # [TB, 1]

    # Single unmasked lane-dense store: actor hidden in lanes [0,H), value in [H,2H).
    lane = jax.lax.broadcasted_iota(jnp.int32, out_ref.shape, 1)
    out_ref[...] = jnp.where(lane < H, h2, value).astype(out_ref.dtype)


def pack_params(params, hidden=64):
    """One-time packing of PyTorch-layout params into 3 kernel operands."""
    H = hidden
    w1 = jnp.concatenate(
        [params["actor_w1"].T, params["critic_w1"].T], axis=1
    ).astype(jnp.float32)                                           # [D, 2H]

    w2 = jnp.zeros((2 * H, 2 * H), jnp.float32)
    w2 = w2.at[:H, :H].set(params["actor_w2"].T)
    w2 = w2.at[H:, H:].set(params["critic_w2"].T)                   # [2H, 2H]

    b1 = jnp.concatenate([params["actor_b1"], params["critic_b1"]]).reshape(1, 2 * H)
    b2 = jnp.concatenate([params["actor_b2"], params["critic_b2"]]).reshape(1, 2 * H)
    wv = jnp.concatenate(
        [jnp.zeros((H,), jnp.float32), params["critic_linear_w"].reshape(H)]
    ).reshape(1, 2 * H)
    bv = jnp.full((1, 2 * H), params["critic_linear_b"][0], jnp.float32)
    aux = jnp.concatenate([b1, b2, wv, bv], axis=0).astype(jnp.float32)  # [4, 2H]

    return {"w1": w1, "w2": w2, "aux": aux, "hidden": H}


def mlp_base_forward(inputs, states, masks, packed, *, tile_b=512):
    """Pallas forward. Returns (value [B,1], hidden_actor [B,64], states)."""
    B, D = inputs.shape
    H = packed["hidden"]
    HO = 2 * H

    # Batch tile: multiple of 8 (sublane), capped so 2x double-buffered
    # (TB*D + TB*HO + weights)*4B stays well inside v7x's 32 MiB scoped VMEM.
    TB = min(tile_b, max(8, B))
    TB = ((TB + 7) // 8) * 8
    Bp = ((B + TB - 1) // TB) * TB
    if Bp != B:
        inputs_p = jnp.zeros((Bp, D), inputs.dtype).at[:B].set(inputs)
    else:
        inputs_p = inputs

    w1, w2, aux = packed["w1"], packed["w2"], packed["aux"]

    out = pl.pallas_call(
        _mlp_base_fused_kernel,
        out_shape=jax.ShapeDtypeStruct((Bp, HO), jnp.float32),
        grid=(Bp // TB,),
        in_specs=[
            pl.BlockSpec((TB, D), lambda i: (i, 0)),
            pl.BlockSpec(w1.shape, lambda i: (0, 0)),
            pl.BlockSpec(w2.shape, lambda i: (0, 0)),
            pl.BlockSpec(aux.shape, lambda i: (0, 0)),
        ],
        out_specs=pl.BlockSpec((TB, HO), lambda i: (i, 0)),
        compiler_params=pltpu.CompilerParams(
            dimension_semantics=("parallel",)
        ),
    )(inputs_p, w1, w2, aux)

    hidden_actor = out[:B, :H]
    value = out[:B, H:H + 1]
    return value, hidden_actor, states


def init_normc(key, shape):
    """PyTorch init_normc_: normal(0,1) normalized along the input dim (weight [out,in])."""
    w = jax.random.normal(key, shape, dtype=jnp.float32)
    w = w / jnp.sqrt(jnp.sum(jnp.square(w), axis=1, keepdims=True))
    return w


def make_params(key, num_inputs, hidden=64):
    ks = jax.random.split(key, 5)
    return {
        "actor_w1": init_normc(ks[0], (hidden, num_inputs)),
        "actor_b1": jnp.zeros((hidden,), jnp.float32),
        "actor_w2": init_normc(ks[1], (hidden, hidden)),
        "actor_b2": jnp.zeros((hidden,), jnp.float32),
        "critic_w1": init_normc(ks[2], (hidden, num_inputs)),
        "critic_b1": jnp.zeros((hidden,), jnp.float32),
        "critic_w2": init_normc(ks[3], (hidden, hidden)),
        "critic_b2": jnp.zeros((hidden,), jnp.float32),
        "critic_linear_w": init_normc(ks[4], (1, hidden)),
        "critic_linear_b": jnp.zeros((1,), jnp.float32),
    }


def reference_forward(inputs, states, masks, params):
    """Pure-JAX reference (mirrors the PyTorch module)."""
    def linear(x, w, b):
        return x @ w.T + b

    ha = jnp.tanh(linear(inputs, params["actor_w1"], params["actor_b1"]))
    ha = jnp.tanh(linear(ha, params["actor_w2"], params["actor_b2"]))
    hc = jnp.tanh(linear(inputs, params["critic_w1"], params["critic_b1"]))
    hc = jnp.tanh(linear(hc, params["critic_w2"], params["critic_b2"]))
    value = linear(hc, params["critic_linear_w"], params["critic_linear_b"])
    return value, ha, states


if __name__ == "__main__":
    key = jax.random.PRNGKey(0)
    k_in, k_par = jax.random.split(key)

    batch, num_inputs = 8, 32
    inputs = jax.random.normal(k_in, (batch, num_inputs), dtype=jnp.float32)
    states = jnp.zeros((batch, 1), jnp.float32)   # state_size == 1
    masks = jnp.ones((batch, 1), jnp.float32)

    params = make_params(k_par, num_inputs)
    packed = pack_params(params)                   # one-time packing (cached pytree)

    value, hidden_actor, out_states = mlp_base_forward(inputs, states, masks, packed)
    jax.block_until_ready((value, hidden_actor, out_states))

    ref_value, ref_actor, _ = reference_forward(inputs, states, masks, params)
    assert value.shape == (batch, 1)
    assert hidden_actor.shape == (batch, 64)
    assert jnp.allclose(value, ref_value, atol=1e-5, rtol=1e-5)
    assert jnp.allclose(hidden_actor, ref_actor, atol=1e-5, rtol=1e-5)

    print("KERNEL_OK")
</pallas_src>

<mosaic_0001>
module attributes {stable_mosaic.version = 11 : i64} {
  func.func @_mlp_base_fused_kernel(%arg0: i32, %arg1: memref<8x32xf32, #tpu.memory_space<vmem>>, %arg2: memref<32x128xf32, #tpu.memory_space<vmem>>, %arg3: memref<128x128xf32, #tpu.memory_space<vmem>>, %arg4: memref<4x128xf32, #tpu.memory_space<vmem>>, %arg5: memref<8x128xf32, #tpu.memory_space<vmem>>) attributes {dimension_semantics = [#tpu.dimension_semantics<parallel>], iteration_bounds = array<i64: 1>, scalar_prefetch = 0 : i64, scratch_operands = 0 : i64, tpu.core_type = #tpu.core_type<tc>, window_params = [{transform_indices = @transform_0, window_bounds = array<i64: 8, 32>}, {pipeline_mode = #tpu.pipeline_mode<synchronous>, transform_indices = @transform_1, window_bounds = array<i64: 32, 128>}, {pipeline_mode = #tpu.pipeline_mode<synchronous>, transform_indices = @transform_2, window_bounds = array<i64: 128, 128>}, {pipeline_mode = #tpu.pipeline_mode<synchronous>, transform_indices = @transform_3, window_bounds = array<i64: 4, 128>}, {transform_indices = @transform_4, window_bounds = array<i64: 8, 128>}]} {
    %c0 = arith.constant 0 : index
    %c0_0 = arith.constant 0 : index
    %0 = vector.load %arg1[%c0, %c0_0] : memref<8x32xf32, #tpu.memory_space<vmem>>, vector<8x32xf32>
    %c0_1 = arith.constant 0 : index
    %c0_2 = arith.constant 0 : index
    %1 = vector.load %arg4[%c0_1, %c0_2] : memref<4x128xf32, #tpu.memory_space<vmem>>, vector<1x128xf32>
    %c1 = arith.constant 1 : index
    %c0_3 = arith.constant 0 : index
    %2 = vector.load %arg4[%c1, %c0_3] : memref<4x128xf32, #tpu.memory_space<vmem>>, vector<1x128xf32>
    %c2 = arith.constant 2 : index
    %c0_4 = arith.constant 0 : index
    %3 = vector.load %arg4[%c2, %c0_4] : memref<4x128xf32, #tpu.memory_space<vmem>>, vector<1x128xf32>
    %c3 = arith.constant 3 : index
    %c0_5 = arith.constant 0 : index
    %4 = vector.load %arg4[%c3, %c0_5] : memref<4x128xf32, #tpu.memory_space<vmem>>, vector<1x1xf32>
    %c0_6 = arith.constant 0 : index
    %c0_7 = arith.constant 0 : index
    %5 = vector.load %arg2[%c0_6, %c0_7] : memref<32x128xf32, #tpu.memory_space<vmem>>, vector<32x128xf32>
    %cst = arith.constant dense<0.000000e+00> : vector<8x128xf32>
    %6 = tpu.matmul %0, %5, %cst {dimension_numbers = #tpu.dot_dimension_numbers<[1], [0], [0], [1], [0, 0, 1, 1], [], []>} : vector<8x32xf32>, vector<32x128xf32>, vector<8x128xf32> -> vector<8x128xf32>
    %7 = vector.broadcast %1 : vector<1x128xf32> to vector<8x128xf32>
    %8 = arith.addf %6, %7 : vector<8x128xf32>
    %9 = math.tanh %8 : vector<8x128xf32>
    %c0_8 = arith.constant 0 : index
    %c0_9 = arith.constant 0 : index
    %10 = vector.load %arg3[%c0_8, %c0_9] : memref<128x128xf32, #tpu.memory_space<vmem>>, vector<128x128xf32>
    %cst_10 = arith.constant dense<0.000000e+00> : vector<8x128xf32>
    %11 = tpu.matmul %9, %10, %cst_10 {dimension_numbers = #tpu.dot_dimension_numbers<[1], [0], [0], [1], [0, 0, 1, 1], [], []>} : vector<8x128xf32>, vector<128x128xf32>, vector<8x128xf32> -> vector<8x128xf32>
    %12 = vector.broadcast %2 : vector<1x128xf32> to vector<8x128xf32>
    %13 = arith.addf %11, %12 : vector<8x128xf32>
    %14 = math.tanh %13 : vector<8x128xf32>
    %15 = vector.broadcast %3 : vector<1x128xf32> to vector<8x128xf32>
    %16 = arith.mulf %14, %15 : vector<8x128xf32>
    %cst_11 = arith.constant dense<0.000000e+00> : vector<8xf32>
    %17 = vector.multi_reduction <add>, %16, %cst_11 [1] : vector<8x128xf32> to vector<8xf32>
    %18 = vector.shape_cast %17 : vector<8xf32> to vector<8x1xf32>
    %19 = vector.broadcast %4 : vector<1x1xf32> to vector<8x1xf32>
    %20 = arith.addf %18, %19 : vector<8x1xf32>
    %21 = tpu.iota {dimensions = array<i32: 1>} : vector<8x128xi32>
    %c64_i32 = arith.constant 64 : i32
    %22 = vector.broadcast %c64_i32 : i32 to vector<8x128xi32>
    %23 = arith.cmpi slt, %21, %22 : vector<8x128xi32>
    %24 = vector.shape_cast %20 : vector<8x1xf32> to vector<8x1xf32>
    %25 = vector.broadcast %24 : vector<8x1xf32> to vector<8x128xf32>
    %26 = arith.select %23, %14, %25 : vector<8x128xi1>, vector<8x128xf32>
    %c0_12 = arith.constant 0 : index
    %c0_13 = arith.constant 0 : index
    %27 = vector.load %arg5[%c0_12, %c0_13] : memref<8x128xf32, #tpu.memory_space<vmem>>, vector<8x128xf32>
    tpu.vector_store %arg5[%c0_12, %c0_13], %26 {strides = array<i32>} : memref<8x128xf32, #tpu.memory_space<vmem>>, vector<8x128xf32>,
    return
  }
  func.func @transform_0(%arg0: i32) -> (i32, i32) {
    %c0_i32 = arith.constant 0 : i32
    %c0_i32_0 = arith.constant 0 : i32
    return %arg0, %c0_i32 : i32, i32
  }
  func.func @transform_1(%arg0: i32) -> (i32, i32) {
    %c0_i32 = arith.constant 0 : i32
    %c0_i32_0 = arith.constant 0 : i32
    %c0_i32_1 = arith.constant 0 : i32
    return %c0_i32, %c0_i32_0 : i32, i32
  }
  func.func @transform_2(%arg0: i32) -> (i32, i32) {
    %c0_i32 = arith.constant 0 : i32
    %c0_i32_0 = arith.constant 0 : i32
    %c0_i32_1 = arith.constant 0 : i32
    return %c0_i32, %c0_i32_0 : i32, i32
  }
  func.func @transform_3(%arg0: i32) -> (i32, i32) {
    %c0_i32 = arith.constant 0 : i32
    %c0_i32_0 = arith.constant 0 : i32
    %c0_i32_1 = arith.constant 0 : i32
    return %c0_i32, %c0_i32_0 : i32, i32
  }
  func.func @transform_4(%arg0: i32) -> (i32, i32) {
    %c0_i32 = arith.constant 0 : i32
    %c0_i32_0 = arith.constant 0 : i32
    return %arg0, %c0_i32 : i32, i32
  }
}

</mosaic_0001>

<bundles_post_ra>
// kernel: tpu_custom_call.1
= control target key start
LH: loop header
LB: loop body
LE: loop exit
PB: predicated region body
PF: predicated region fallthrough
CT: control target
= control target key end

     0   :  { %9 = vsyncpa [#allocation3], 0  ;;  %s379_s0 = inlined_call_operand.hbm [shape: f32[8,32], index: 0, kind: input, shape index: {}]   ;;  %s380_s1 = inlined_call_operand.hbm [shape: f32[32,128], index: 1, kind: input, shape index: {}]   ;;  %s381_s2 = inlined_call_operand.hbm [shape: f32[128,128], index: 2, kind: input, shape index: {}]   ;;  %s382_s3 = inlined_call_operand.hbm [shape: f32[4,128], index: 3, kind: input, shape index: {}]   ;;  %s383_s4 = inlined_call_operand.hbm [shape: f32[8,128], index: 4, kind: output, shape index: {}]  }
   0x1   :  { %10 = vsyncpa [#allocation6], 0 }
   0x2   :  { %11 = vsyncpa [#allocation9], 0  ;;  %s28_s17 = sshll.u32 %s380_s1, 4  ;;  %s29_s17 = int_to_ptr.hbm [resolvable:$true] %s28_s17 }
   0x3   :  { %12 = vsyncpa [#allocation4], 0  ;;  %s331_s18 = smov [#allocation5]   ;;  %s18_s22 = sshll.u32 %s379_s0, 4  ;;  %s19_s22 = int_to_ptr.hbm [resolvable:$true] %s18_s22 }
   0x4   :  { %s30_s19 = sshll.u32 %s331_s18, 4  ;;  %s332_s23 = smov 128   ;;  %s31_s19 = int_to_ptr.vmem [resolvable:$true] %s30_s19 }
   0x5   :  { %s333_s24 = smov 8   ;;  %s334_s25 = smov [#allocation2]  }
   0x6   :  { %36 = dma.hbm_to_vmem [thread:$0]  %s29_s17, 512, %s31_s19, [#allocation6], %s332_s23, %s332_s23, %s333_s24  }
   0x7   :  { %s20_s26 = sshll.u32 %s334_s25, 4  ;;  %s41_s29 = sshll.u32 %s381_s2, 4  ;;  %s21_s26 = int_to_ptr.vmem [resolvable:$true] %s20_s26  ;;  %s42_s29 = int_to_ptr.hbm [resolvable:$true] %s41_s29 }
   0x8   :  { %23 = dma.hbm_to_vmem [thread:$0]  %s19_s22, 128, %s21_s26, [#allocation3]  }
   0x9   :  { %s55_s5 = sshll.u32 %s382_s3, 4  ;;  %s335_s6 = smov [#allocation7]   ;;  %s56_s5 = int_to_ptr.hbm [resolvable:$true] %s55_s5 }
   0xa   :  { %s43_s7 = sshll.u32 %s335_s6, 4  ;;  %s336_s0 = smov [#allocation8]   ;;  %s44_s7 = int_to_ptr.vmem [resolvable:$true] %s43_s7 }
   0xb   :  { %49 = dma.hbm_to_vmem [thread:$0]  %s42_s29, 2048, %s44_s7, [#allocation6], %s332_s23, %s332_s23, %s333_s24  }
   0xc   :  { %s57_s8 = sshll.u32 %s336_s0, 4  ;;  %s58_s8 = int_to_ptr.vmem [resolvable:$true] %s57_s8 }
   0xd   :  { %60 = dma.hbm_to_vmem [thread:$0]  %s56_s5, 64, %s58_s8, [#allocation9]  }
   0xe   :  { %323 = dma.done.wait [#allocation3], 128  }
   0xf   :  { %324 = vsyncadd [#allocation3], 4294967168 }
  0x10   :  { %325 = dma.done.wait [#allocation6], 2560  }
  0x11   :  { %326 = vsyncadd [#allocation6], 4294964736 }
  0x12   :  { %327 = dma.done.wait [#allocation9], 64  }
  0x13   :  { %328 = vsyncadd [#allocation9], 4294967232  ;;  %v85_v0 = vld [vmem:[#allocation5 + $0x18] sm:$0xff]  ;;  %v84_v1 = vld [vmem:[#allocation5 + $0x10] sm:$0xff]  ;;  %vm87_vm0 = vcmask 261120   ;;  %v337_v31 = vmov 0   ;;  %v156_v35 = vlaneseq }
  0x14   :  { %103 = vmatpush.msra.mxu0 %v85_v0  ;;  %v127_v2 = vld [vmem:[#allocation7 + $0x78] sm:$0xff]  ;;  %v83_v3 = vld [vmem:[#allocation5 + $0x8] sm:$0xff]  ;;  %v126_v4 = vld [vmem:[#allocation7 + $0x70] sm:$0xff]  ;;  %194 = vset.pattern.permute.xlu0 %v337_v31  ;;  %s338_s2 = smov [#allocation10]   ;;  %s173_s11 = sshll.u32 %s383_s4, 4  ;;  %s174_s11 = int_to_ptr.hbm [resolvable:$true] %s173_s11 }
  0x15   :  { %129 = vmatpush.msra.mxu1 %v127_v2  ;;  %v125_v5 = vld [vmem:[#allocation7 + $0x68] sm:$0xff]  ;;  %v82_v6 = vld [vmem:[#allocation5] sm:$0xff]  ;;  %v77_v7 = vld [vmem:[#allocation2] sm:$0xff]  ;;  %v157_v36 = vand.u32 127, %v156_v35  ;;  %s171_s3 = sshll.u32 %s338_s2, 4  ;;  %s172_s3 = int_to_ptr.vmem [resolvable:$true] %s171_s3 }
  0x16   :  { %104 = vmatpush.msra.mxu0 %v84_v1  ;;  %v124_v8 = vld [vmem:[#allocation7 + $0x60] sm:$0xff]  ;;  %v123_v9 = vld [vmem:[#allocation7 + $0x58] sm:$0xff]  ;;  %v122_v10 = vld [vmem:[#allocation7 + $0x50] sm:$0xff] }
  0x17   :  { %130 = vmatpush.msra.mxu1 %v126_v4  ;;  %v121_v11 = vld [vmem:[#allocation7 + $0x48] sm:$0xff]  ;;  %v120_v12 = vld [vmem:[#allocation7 + $0x40] sm:$0xff]  ;;  %v119_v13 = vld [vmem:[#allocation7 + $0x38] sm:$0xff]  ;;  %vm158_vm1 = vcmp.lt.s32.totalorder %v157_v36, 64 }
  0x18   :  { %105 = vmatpush.msra.mxu0 %v83_v3  ;;  %v118_v14 = vld [vmem:[#allocation7 + $0x30] sm:$0xff]  ;;  %v117_v15 = vld [vmem:[#allocation7 + $0x28] sm:$0xff]  ;;  %v116_v16 = vld [vmem:[#allocation7 + $0x20] sm:$0xff] }
  0x19   :  { %131 = vmatpush.msra.mxu1 %v125_v5  ;;  %v115_v17 = vld [vmem:[#allocation7 + $0x18] sm:$0xff]  ;;  %v114_v18 = vld [vmem:[#allocation7 + $0x10] sm:$0xff]  ;;  %v113_v19 = vld [vmem:[#allocation7 + $0x8] sm:$0xff] }
  0x1a   :  { %106 = vmatpush.msra.mxu0 %v82_v6  ;;  %v112_v20 = vld [vmem:[#allocation7] sm:$0xff] }
  0x1b   :  { %185 = vmatmul.msk.f32.vlgmr.msra.gmra.mxu0 %vm87_vm0, %v77_v7  ;;  %132 = vmatpush.msra.mxu1 %v124_v8  ;;  %v195_v21 = vld [vmem:[#allocation8] ss:$0 sm:$0xff]  ;;  %v196_v25 = vld [vmem:[#allocation8 + $0x1] ss:$0 sm:$0xff]  ;;  %v197_v28 = vld [vmem:[#allocation8 + $0x2] ss:$0 sm:$0xff] }
  0x1c   :  { %v198_v32 = vld [vmem:[#allocation8 + $0x3] ss:$0 sm:$0xff] }
  0x1d   :  { %133 = vmatpush.msra.mxu1 %v123_v9 }
  0x1f   :  { %134 = vmatpush.msra.mxu1 %v122_v10 }
  0x21   :  { %135 = vmatpush.msra.mxu1 %v121_v11 }
  0x23   :  { %136 = vmatpush.msra.mxu1 %v120_v12 }
  0x25   :  { %137 = vmatpush.msra.mxu1 %v119_v13 }
  0x27   :  { %138 = vmatpush.msra.mxu1 %v118_v14 }
  0x29   :  { %139 = vmatpush.msra.mxu1 %v117_v15 }
  0x2b   :  { %140 = vmatpush.msra.mxu1 %v116_v16 }
  0x2d   :  { %141 = vmatpush.msra.mxu1 %v115_v17 }
  0x2f   :  { %142 = vmatpush.msra.mxu1 %v114_v18 }
  0x31   :  { %143 = vmatpush.msra.mxu1 %v113_v19 }
  0x33   :  { %144 = vmatpush.msra.mxu1 %v112_v20 }
  0x98   :  { %v108_v22 = vpop.f32.mrf.mxu0 }
  0x99   :  { %v109_v23 = vadd.f32 %v195_v21, %v108_v22 }
  0x9b   :  { %199 = vtanh.f32 %v109_v23 }
  0xa1   :  { %v200_v24 = vpop.eup %199 }
  0xa2   :  { %145 = vmatmul.f32.vlgmr.msra.gmra.mxu1 %v200_v24 }
 0x11f   :  { %v146_v26 = vpop.f32.mrf.mxu1 }
 0x120   :  { %v147_v27 = vadd.f32 %v196_v25, %v146_v26 }
 0x122   :  { %201 = vtanh.f32 %v147_v27 }
 0x128   :  { %v202_v29 = vpop.eup %201 }
 0x129   :  { %v151_v30 = vmul.f32 %v202_v29, %v197_v28 }
 0x12b   :  { %152 = vadd.xlane.f32.xlu0 %v151_v30 }
 0x19e   :  { %v153_v33 = vpop.xlane.xlu0 %152 }
 0x19f   :  { %v155_v34 = vadd.f32 %v198_v32, %v153_v33 }
 0x1a1   :  { %161 = vperm.xlu0 %194, %v155_v34  }
 0x213   :  { %v162_v37 = vpop.permute.xlu0 %161 }
 0x214   :  { %v164_v38 = vsel %vm158_vm1, %v202_v29, %v162_v37 }
 0x215   :  { %165 = vst [vmem:[#allocation10] sm:$0xff] %v164_v38 }
 0x216   :  { %176 = dma.vmem_to_hbm [thread:$0]  %s172_s3, 128, %s174_s11, [#allocation4]  }
 0x217   :  { %329 = dma.done.wait [#allocation4], 128  }
 0x218   :  { %330 = vsyncadd [#allocation4], 4294967168 }
 0x219   :  { %181 = vsyncpa [#allocation3], 1 }
 0x21a   :  { %182 = vsyncpa [#allocation6], 1 }
 0x21b   :  { %183 = vsyncpa [#allocation9], 1 }
 0x21c   :  { %184 = vsyncpa [#allocation4], 1 }

</bundles_post_ra>
